<compile_context>
chip_gen: v7x
topology: tpu7x:2x2x1
jax: 0.10.0
libtpu: 0.0.40
codegen_flags: <defaults>
</compile_context>

<pallas_src>
import math
import jax
import jax.numpy as jnp
from jax.experimental import pallas as pl
from jax.experimental.pallas import tpu as pltpu

_VMEM_LIMIT = 64 * 1024 * 1024  # raise above 16/32 MiB scoped defaults; <= v7x physical


# ----------------------------- Serial weight-evolution kernel -----------------------------
# grid = (T // Tb,), "arbitrary" (recurrent).  All blocks are O(F_in * F_out_p) — no N.

def evolve_kernel(q0_ref, w_ref, u_ref, uh_ref, b_ref, z_ref, w_out_ref, q_scratch):
    F_in, F_out_p = q0_ref.shape
    Tb = w_out_ref.shape[0]

    @pl.when(pl.program_id(0) == 0)
    def _():
        q_scratch[...] = q0_ref[...]

    # Q-independent gate half for the whole time block: one lane-dense MXU push.
    #   [Wu;Wr;Wh] (3F_in,F_in) @ [Z_0|...|Z_{Tb-1}] (F_in, Tb*F_out_p) + tiled bias
    G_all = jnp.dot(w_ref[...], z_ref[...],
                    preferred_element_type=jnp.float32) + b_ref[...]

    Q = q_scratch[...]
    # Static unroll over the time block: all slice offsets are compile-time constants
    # (lane offsets multiples of 128, sublane offsets multiples of 8 when F_in % 8 == 0).
    for t in range(Tb):
        Gt = G_all[:, t * F_out_p:(t + 1) * F_out_p]                  # (3F_in, F_out_p)
        UQ = jnp.dot(u_ref[...], Q, preferred_element_type=jnp.float32)  # (2F_in, F_out_p)
        update = jax.nn.sigmoid(Gt[0:F_in] + UQ[0:F_in])
        reset = jax.nn.sigmoid(Gt[F_in:2 * F_in] + UQ[F_in:2 * F_in])
        # mat_GRU_cell.htilda uses ReLU in this module (per the PyTorch spec).
        h_cap = jnp.maximum(
            Gt[2 * F_in:3 * F_in]
            + jnp.dot(uh_ref[...], reset * Q, preferred_element_type=jnp.float32), 0.0)
        Q = (1.0 - update) * Q + update * h_cap
        w_out_ref[t] = Q                                               # lane-dense store
    q_scratch[...] = Q


# ----------------------------- Parallel GCN projection kernel -----------------------------
# grid = (T, N // tm), both "parallel".  out = ReLU((A_tile @ X_t) @ Q_t), A@X fused in.

def gcn_out_kernel(a_ref, x_ref, q_ref, o_ref):
    ax = jnp.dot(a_ref[...], x_ref[...], preferred_element_type=jnp.float32)   # (tm, F_in)
    o_ref[...] = jnp.maximum(
        jnp.dot(ax, q_ref[...], preferred_element_type=jnp.float32), 0.0)      # (tm, F_out_p)


# ----------------------------- JAX glue (TopK) -----------------------------

def topk_select(node_embs, mask, scorer, k):
    """TopK.forward for k <= num_nodes. node_embs: (N, F_in), mask: (N,), scorer: (F_in, 1)."""
    scores = (node_embs @ scorer) / jnp.linalg.norm(scorer)      # (N, 1)
    scores = scores + mask[:, None]                              # mask: 1.0 visible / -inf masked
    flat = scores[:, 0]
    vals, idx = jax.lax.top_k(flat, k)
    valid = vals > -jnp.inf
    num_valid = jnp.sum(valid.astype(jnp.int32))
    # pad_with_last_val: replace invalid (-inf) picks with the last valid index
    last_valid = idx[jnp.maximum(num_valid - 1, 0)]
    idx = jnp.where(jnp.arange(k) < num_valid, idx, last_valid)
    sel_nodes = node_embs[idx]                                    # (k, F_in)
    sel_scores = flat[idx]                                        # (k,)  (mask included, as in TopK.forward)
    out = sel_nodes * jnp.tanh(sel_scores)[:, None]               # (k, F_in)
    return out.T                                                  # (F_in, k)


# ----------------------------- Helpers -----------------------------

def _round_up(x, m):
    return ((x + m - 1) // m) * m


def _choose_time_block(T, max_tb=8):
    for tb in range(min(T, max_tb), 0, -1):
        if T % tb == 0:
            return tb
    return 1


def _choose_row_tile(N, max_tm=512):
    if N <= max_tm:
        return N
    for tm in range(max_tm, 7, -1):
        if N % tm == 0 and tm % 8 == 0:
            return tm
    # TODO(synk): for awkward N, fall back to a masked remainder tile instead of full N.
    return N


# ----------------------------- Wrapper -----------------------------

def grcu_forward(A_seq, X_seq, mask_seq, params):
    T, N, F_in = X_seq.shape
    F_out = params["gcn_init"].shape[1]
    F_out_p = _round_up(F_out, 128)          # lane-dense padding; padded cols stay zero
    pad = F_out_p - F_out
    Tb = _choose_time_block(T)
    tm = _choose_row_tile(N)

    # 1) TopK summary per timestep (data-dependent gather -> plain JAX, vmapped over T).
    # TODO(synk): only the k <= num_nodes branch of TopK is implemented (true here).
    Z_seq = jax.vmap(lambda x, m: topk_select(x, m, params["scorer"], F_out))(
        X_seq, mask_seq)                                          # (T, F_in, F_out)
    Z_p = jnp.pad(Z_seq, ((0, 0), (0, 0), (0, pad)))              # (T, F_in, F_out_p)
    # Lane-concatenate each time block: (T//Tb, F_in, Tb*F_out_p)
    Z_blk = (Z_p.reshape(T // Tb, Tb, F_in, F_out_p)
                 .transpose(0, 2, 1, 3)
                 .reshape(T // Tb, F_in, Tb * F_out_p))

    # Pack gate parameters (fewer refs -> fewer DMAs; enables fused matmuls).
    q0_p = jnp.pad(params["gcn_init"], ((0, 0), (0, pad)))
    W_stack = jnp.concatenate([params["Wu"], params["Wr"], params["Wh"]], axis=0)  # (3F_in, F_in)
    U_stack = jnp.concatenate([params["Uu"], params["Ur"]], axis=0)                # (2F_in, F_in)
    b_stack = jnp.pad(
        jnp.concatenate([params["bu"], params["br"], params["bh"]], axis=0),
        ((0, 0), (0, pad)))                                                        # (3F_in, F_out_p)
    b_tiled = jnp.tile(b_stack, (1, Tb))                                           # (3F_in, Tb*F_out_p)

    c2 = lambda tb: (0, 0)

    # 2) Serial recurrence over time blocks: emits only the evolved weights.
    w_seq_p = pl.pallas_call(
        evolve_kernel,
        out_shape=jax.ShapeDtypeStruct((T, F_in, F_out_p), jnp.float32),
        grid_spec=pltpu.PrefetchScalarGridSpec(
            num_scalar_prefetch=0,
            grid=(T // Tb,),
            in_specs=[
                pl.BlockSpec((F_in, F_out_p), c2),                    # GCN_init_weights (padded)
                pl.BlockSpec((3 * F_in, F_in), c2),                   # [Wu; Wr; Wh]
                pl.BlockSpec((2 * F_in, F_in), c2),                   # [Uu; Ur]
                pl.BlockSpec((F_in, F_in), c2),                       # Uh
                pl.BlockSpec((3 * F_in, Tb * F_out_p), c2),           # biases, lane-tiled per block
                pl.BlockSpec((None, F_in, Tb * F_out_p), lambda tb: (tb, 0, 0)),  # Z block
            ],
            out_specs=pl.BlockSpec((Tb, F_in, F_out_p), lambda tb: (tb, 0, 0)),
            scratch_shapes=[pltpu.VMEM((F_in, F_out_p), jnp.float32)],  # Q carried across blocks
        ),
        compiler_params=pltpu.CompilerParams(
            dimension_semantics=("arbitrary",),                       # recurrent over time
            vmem_limit_bytes=_VMEM_LIMIT),
        cost_estimate=pl.CostEstimate(
            flops=2 * T * 6 * F_in * F_in * F_out_p,
            transcendentals=4 * T * F_in * F_out_p,
            bytes_accessed=4 * (2 * T * F_in * F_out_p
                                + 6 * F_in * F_in + 3 * F_in * F_out_p * Tb)),
    )(q0_p, W_stack, U_stack, params["Uh"], b_tiled, Z_blk)

    # 3) Fully parallel, row-tiled, lane-dense GCN projection: ReLU((A@X) @ Q_t).
    #    (A@X fused here, so it never round-trips HBM.)
    # TODO(synk): optionally feed A/X as bf16 (f32 accumulate) for ~2x HBM traffic cut;
    #             kept f32 to preserve the reference module's numerics.
    out_p = pl.pallas_call(
        gcn_out_kernel,
        out_shape=jax.ShapeDtypeStruct((T, N, F_out_p), jnp.float32),
        grid_spec=pltpu.PrefetchScalarGridSpec(
            num_scalar_prefetch=0,
            grid=(T, N // tm),
            in_specs=[
                pl.BlockSpec((None, tm, N), lambda t, n: (t, n, 0)),        # A row tile
                pl.BlockSpec((None, N, F_in), lambda t, n: (t, 0, 0)),      # X_t (reused across n)
                pl.BlockSpec((None, F_in, F_out_p), lambda t, n: (t, 0, 0)),  # evolved Q_t
            ],
            out_specs=pl.BlockSpec((None, tm, F_out_p), lambda t, n: (t, n, 0)),
        ),
        compiler_params=pltpu.CompilerParams(
            dimension_semantics=("parallel", "parallel"),
            vmem_limit_bytes=_VMEM_LIMIT),
        cost_estimate=pl.CostEstimate(
            flops=2 * T * N * (N * F_in + F_in * F_out_p),
            transcendentals=0,
            bytes_accessed=4 * (T * N * N + T * N * F_in
                                + T * F_in * F_out_p + T * N * F_out_p)),
    )(A_seq, X_seq, w_seq_p)

    # Slice the lane padding back off on the host side.
    return out_p[..., :F_out], w_seq_p[..., :F_out]


# ----------------------------- Pure-JAX reference -----------------------------

def grcu_reference(A_seq, X_seq, mask_seq, params):
    hi = jax.lax.Precision.HIGHEST
    T = X_seq.shape[0]
    F_out = params["gcn_init"].shape[1]
    Q = params["gcn_init"]
    outs, ws = [], []
    for t in range(T):
        Z = topk_select(X_seq[t], mask_seq[t], params["scorer"], F_out)
        update = jax.nn.sigmoid(jnp.dot(params["Wu"], Z, precision=hi)
                                + jnp.dot(params["Uu"], Q, precision=hi) + params["bu"])
        reset = jax.nn.sigmoid(jnp.dot(params["Wr"], Z, precision=hi)
                               + jnp.dot(params["Ur"], Q, precision=hi) + params["br"])
        h_cap = jax.nn.relu(jnp.dot(params["Wh"], Z, precision=hi)
                            + jnp.dot(params["Uh"], reset * Q, precision=hi) + params["bh"])
        Q = (1.0 - update) * Q + update * h_cap
        ws.append(Q)
        outs.append(jax.nn.relu(
            jnp.dot(A_seq[t], jnp.dot(X_seq[t], Q, precision=hi), precision=hi)))
    return jnp.stack(outs), jnp.stack(ws)


# ----------------------------- Parameter init -----------------------------

def init_params(key, in_feats, out_feats):
    ks = jax.random.split(key, 8)
    stdv_w = 1.0 / math.sqrt(in_feats)    # gate W/U: uniform(-1/sqrt(cols))
    stdv_g = 1.0 / math.sqrt(out_feats)   # GCN_init_weights: 1/sqrt(out_feats)
    stdv_s = 1.0 / math.sqrt(in_feats)    # scorer: 1/sqrt(feats)
    u = lambda k, shape, s: jax.random.uniform(k, shape, jnp.float32, -s, s)
    return {
        "gcn_init": u(ks[0], (in_feats, out_feats), stdv_g),
        "scorer":   u(ks[1], (in_feats, 1), stdv_s),
        "Wu": u(ks[2], (in_feats, in_feats), stdv_w),
        "Uu": u(ks[3], (in_feats, in_feats), stdv_w),
        "bu": jnp.zeros((in_feats, out_feats), jnp.float32),
        "Wr": u(ks[4], (in_feats, in_feats), stdv_w),
        "Ur": u(ks[5], (in_feats, in_feats), stdv_w),
        "br": jnp.zeros((in_feats, out_feats), jnp.float32),
        "Wh": u(ks[6], (in_feats, in_feats), stdv_w),
        "Uh": u(ks[7], (in_feats, in_feats), stdv_w),
        "bh": jnp.zeros((in_feats, out_feats), jnp.float32),
    }


# ----------------------------- Main -----------------------------

if __name__ == "__main__":
    T, N, F_in, F_out = 4, 16, 16, 8     # timesteps, nodes, in_feats, out_feats (= k)

    key = jax.random.PRNGKey(0)
    k_p, k_a, k_x, k_m = jax.random.split(key, 4)

    params = init_params(k_p, F_in, F_out)

    # Symmetric, row-scaled adjacency surrogates (A_hat-like), per timestep.
    A_raw = jax.random.uniform(k_a, (T, N, N), jnp.float32)
    A_sym = 0.5 * (A_raw + jnp.swapaxes(A_raw, 1, 2)) + jnp.eye(N)[None]
    A_seq = A_sym / jnp.sum(A_sym, axis=-1, keepdims=True)

    X_seq = jax.random.normal(k_x, (T, N, F_in), jnp.float32)

    # Mask: 1.0 for visible nodes, -inf for masked nodes (as in create_train_data).
    masked = jax.random.bernoulli(k_m, 0.2, (T, N))
    mask_seq = jnp.where(masked, -jnp.inf, 1.0).astype(jnp.float32)

    out_seq, weights = grcu_forward(A_seq, X_seq, mask_seq, params)
    out_seq = jax.block_until_ready(out_seq)
    weights = jax.block_until_ready(weights)

    assert out_seq.shape == (T, N, F_out)
    assert weights.shape == (T, F_in, F_out)
    assert bool(jnp.all(jnp.isfinite(out_seq))) and bool(jnp.all(jnp.isfinite(weights)))

    ref_out, ref_w = grcu_reference(A_seq, X_seq, mask_seq, params)
    max_diff = float(jnp.max(jnp.abs(out_seq - ref_out)))
    max_diff_w = float(jnp.max(jnp.abs(weights - ref_w)))
    assert max_diff < 5e-2 and max_diff_w < 5e-2, (max_diff, max_diff_w)

    print("KERNEL_OK")
</pallas_src>

<mosaic_0001>
module attributes {stable_mosaic.version = 11 : i64} {
  func.func @evolve_kernel(%arg0: i32, %arg1: memref<16x128xf32, #tpu.memory_space<vmem>>, %arg2: memref<48x16xf32, #tpu.memory_space<vmem>>, %arg3: memref<32x16xf32, #tpu.memory_space<vmem>>, %arg4: memref<16x16xf32, #tpu.memory_space<vmem>>, %arg5: memref<48x512xf32, #tpu.memory_space<vmem>>, %arg6: memref<1x16x512xf32, #tpu.memory_space<vmem>>, %arg7: memref<4x16x128xf32, #tpu.memory_space<vmem>>, %arg8: memref<16x128xf32, #tpu.memory_space<vmem>>) attributes {dimension_semantics = [#tpu.dimension_semantics<arbitrary>], iteration_bounds = array<i64: 1>, scalar_prefetch = 0 : i64, scratch_operands = 1 : i64, tpu.core_type = #tpu.core_type<tc>, window_params = [{pipeline_mode = #tpu.pipeline_mode<synchronous>, transform_indices = @transform_0, window_bounds = array<i64: 16, 128>}, {pipeline_mode = #tpu.pipeline_mode<synchronous>, transform_indices = @transform_1, window_bounds = array<i64: 48, 16>}, {pipeline_mode = #tpu.pipeline_mode<synchronous>, transform_indices = @transform_2, window_bounds = array<i64: 32, 16>}, {pipeline_mode = #tpu.pipeline_mode<synchronous>, transform_indices = @transform_3, window_bounds = array<i64: 16, 16>}, {pipeline_mode = #tpu.pipeline_mode<synchronous>, transform_indices = @transform_4, window_bounds = array<i64: 48, 512>}, {transform_indices = @transform_5, window_bounds = array<i64: 1, 16, 512>}, {transform_indices = @transform_6, window_bounds = array<i64: 4, 16, 128>}]} {
    %c0_i32 = arith.constant 0 : i32
    %0 = arith.cmpi eq, %arg0, %c0_i32 : i32
    %1 = arith.extui %0 : i1 to i32
    %c0_i32_0 = arith.constant 0 : i32
    %2 = arith.cmpi ne, %1, %c0_i32_0 : i32
    scf.if %2 {
      %c0_60 = arith.constant 0 : index
      %c0_61 = arith.constant 0 : index
      %147 = vector.load %arg1[%c0_60, %c0_61] : memref<16x128xf32, #tpu.memory_space<vmem>>, vector<16x128xf32>
      %c0_62 = arith.constant 0 : index
      %c0_63 = arith.constant 0 : index
      %148 = vector.load %arg8[%c0_62, %c0_63] : memref<16x128xf32, #tpu.memory_space<vmem>>, vector<16x128xf32>
      tpu.vector_store %arg8[%c0_62, %c0_63], %147 {strides = array<i32>} : memref<16x128xf32, #tpu.memory_space<vmem>>, vector<16x128xf32>,
    } else {
    }
    %c0 = arith.constant 0 : index
    %c0_1 = arith.constant 0 : index
    %3 = vector.load %arg2[%c0, %c0_1] : memref<48x16xf32, #tpu.memory_space<vmem>>, vector<48x16xf32>
    %c0_2 = arith.constant 0 : index
    %c0_3 = arith.constant 0 : index
    %c0_4 = arith.constant 0 : index
    %4 = vector.load %arg6[%c0_2, %c0_3, %c0_4] : memref<1x16x512xf32, #tpu.memory_space<vmem>>, vector<1x16x512xf32>
    %5 = vector.shape_cast %4 : vector<1x16x512xf32> to vector<16x512xf32>
    %cst = arith.constant dense<0.000000e+00> : vector<48x512xf32>
    %6 = tpu.matmul %3, %5, %cst {dimension_numbers = #tpu.dot_dimension_numbers<[1], [0], [0], [1], [0, 0, 1, 1], [], []>} : vector<48x16xf32>, vector<16x512xf32>, vector<48x512xf32> -> vector<48x512xf32>
    %c0_5 = arith.constant 0 : index
    %c0_6 = arith.constant 0 : index
    %7 = vector.load %arg5[%c0_5, %c0_6] : memref<48x512xf32, #tpu.memory_space<vmem>>, vector<48x512xf32>
    %8 = arith.addf %6, %7 : vector<48x512xf32>
    %c0_7 = arith.constant 0 : index
    %c0_8 = arith.constant 0 : index
    %9 = vector.load %arg8[%c0_7, %c0_8] : memref<16x128xf32, #tpu.memory_space<vmem>>, vector<16x128xf32>
    %10 = vector.extract_strided_slice %8 {offsets = [0, 0], sizes = [48, 128], strides = [1, 1]} : vector<48x512xf32> to vector<48x128xf32>
    %c0_9 = arith.constant 0 : index
    %c0_10 = arith.constant 0 : index
    %11 = vector.load %arg3[%c0_9, %c0_10] : memref<32x16xf32, #tpu.memory_space<vmem>>, vector<32x16xf32>
    %cst_11 = arith.constant dense<0.000000e+00> : vector<32x128xf32>
    %12 = tpu.matmul %11, %9, %cst_11 {dimension_numbers = #tpu.dot_dimension_numbers<[1], [0], [0], [1], [0, 0, 1, 1], [], []>} : vector<32x16xf32>, vector<16x128xf32>, vector<32x128xf32> -> vector<32x128xf32>
    %13 = vector.extract_strided_slice %10 {offsets = [0, 0], sizes = [16, 128], strides = [1, 1]} : vector<48x128xf32> to vector<16x128xf32>
    %14 = vector.extract_strided_slice %12 {offsets = [0, 0], sizes = [16, 128], strides = [1, 1]} : vector<32x128xf32> to vector<16x128xf32>
    %15 = arith.addf %13, %14 : vector<16x128xf32>
    %16 = arith.negf %15 : vector<16x128xf32>
    %17 = math.exp %16 : vector<16x128xf32>
    %cst_12 = arith.constant 1.000000e+00 : f32
    %18 = vector.broadcast %cst_12 : f32 to vector<16x128xf32>
    %19 = arith.addf %18, %17 : vector<16x128xf32>
    %20 = arith.divf %18, %19 : vector<16x128xf32>
    %21 = vector.extract_strided_slice %10 {offsets = [16, 0], sizes = [16, 128], strides = [1, 1]} : vector<48x128xf32> to vector<16x128xf32>
    %22 = vector.extract_strided_slice %12 {offsets = [16, 0], sizes = [16, 128], strides = [1, 1]} : vector<32x128xf32> to vector<16x128xf32>
    %23 = arith.addf %21, %22 : vector<16x128xf32>
    %24 = arith.negf %23 : vector<16x128xf32>
    %25 = math.exp %24 : vector<16x128xf32>
    %cst_13 = arith.constant 1.000000e+00 : f32
    %26 = vector.broadcast %cst_13 : f32 to vector<16x128xf32>
    %27 = arith.addf %26, %25 : vector<16x128xf32>
    %28 = arith.divf %26, %27 : vector<16x128xf32>
    %29 = vector.extract_strided_slice %10 {offsets = [32, 0], sizes = [16, 128], strides = [1, 1]} : vector<48x128xf32> to vector<16x128xf32>
    %c0_14 = arith.constant 0 : index
    %c0_15 = arith.constant 0 : index
    %30 = vector.load %arg4[%c0_14, %c0_15] : memref<16x16xf32, #tpu.memory_space<vmem>>, vector<16x16xf32>
    %31 = arith.mulf %28, %9 : vector<16x128xf32>
    %cst_16 = arith.constant dense<0.000000e+00> : vector<16x128xf32>
    %32 = tpu.matmul %30, %31, %cst_16 {dimension_numbers = #tpu.dot_dimension_numbers<[1], [0], [0], [1], [0, 0, 1, 1], [], []>} : vector<16x16xf32>, vector<16x128xf32>, vector<16x128xf32> -> vector<16x128xf32>
    %33 = arith.addf %29, %32 : vector<16x128xf32>
    %cst_17 = arith.constant 0.000000e+00 : f32
    %34 = vector.broadcast %cst_17 : f32 to vector<16x128xf32>
    %35 = arith.maximumf %33, %34 : vector<16x128xf32>
    %cst_18 = arith.constant 1.000000e+00 : f32
    %36 = vector.broadcast %cst_18 : f32 to vector<16x128xf32>
    %37 = arith.subf %36, %20 : vector<16x128xf32>
    %38 = arith.mulf %37, %9 : vector<16x128xf32>
    %39 = arith.mulf %20, %35 : vector<16x128xf32>
    %40 = arith.addf %38, %39 : vector<16x128xf32>
    %c0_19 = arith.constant 0 : index
    %c0_20 = arith.constant 0 : index
    %c0_21 = arith.constant 0 : index
    %41 = vector.load %arg7[%c0_19, %c0_20, %c0_21] : memref<4x16x128xf32, #tpu.memory_space<vmem>>, vector<1x16x128xf32>
    %42 = vector.shape_cast %41 : vector<1x16x128xf32> to vector<16x128xf32>
    %43 = vector.shape_cast %40 : vector<16x128xf32> to vector<1x16x128xf32>
    tpu.vector_store %arg7[%c0_19, %c0_20, %c0_21], %43 {strides = array<i32>} : memref<4x16x128xf32, #tpu.memory_space<vmem>>, vector<1x16x128xf32>,
    %44 = vector.extract_strided_slice %8 {offsets = [0, 128], sizes = [48, 128], strides = [1, 1]} : vector<48x512xf32> to vector<48x128xf32>
    %c0_22 = arith.constant 0 : index
    %c0_23 = arith.constant 0 : index
    %45 = vector.load %arg3[%c0_22, %c0_23] : memref<32x16xf32, #tpu.memory_space<vmem>>, vector<32x16xf32>
    %cst_24 = arith.constant dense<0.000000e+00> : vector<32x128xf32>
    %46 = tpu.matmul %45, %40, %cst_24 {dimension_numbers = #tpu.dot_dimension_numbers<[1], [0], [0], [1], [0, 0, 1, 1], [], []>} : vector<32x16xf32>, vector<16x128xf32>, vector<32x128xf32> -> vector<32x128xf32>
    %47 = vector.extract_strided_slice %44 {offsets = [0, 0], sizes = [16, 128], strides = [1, 1]} : vector<48x128xf32> to vector<16x128xf32>
    %48 = vector.extract_strided_slice %46 {offsets = [0, 0], sizes = [16, 128], strides = [1, 1]} : vector<32x128xf32> to vector<16x128xf32>
    %49 = arith.addf %47, %48 : vector<16x128xf32>
    %50 = arith.negf %49 : vector<16x128xf32>
    %51 = math.exp %50 : vector<16x128xf32>
    %cst_25 = arith.constant 1.000000e+00 : f32
    %52 = vector.broadcast %cst_25 : f32 to vector<16x128xf32>
    %53 = arith.addf %52, %51 : vector<16x128xf32>
    %54 = arith.divf %52, %53 : vector<16x128xf32>
    %55 = vector.extract_strided_slice %44 {offsets = [16, 0], sizes = [16, 128], strides = [1, 1]} : vector<48x128xf32> to vector<16x128xf32>
    %56 = vector.extract_strided_slice %46 {offsets = [16, 0], sizes = [16, 128], strides = [1, 1]} : vector<32x128xf32> to vector<16x128xf32>
    %57 = arith.addf %55, %56 : vector<16x128xf32>
    %58 = arith.negf %57 : vector<16x128xf32>
    %59 = math.exp %58 : vector<16x128xf32>
    %cst_26 = arith.constant 1.000000e+00 : f32
    %60 = vector.broadcast %cst_26 : f32 to vector<16x128xf32>
    %61 = arith.addf %60, %59 : vector<16x128xf32>
    %62 = arith.divf %60, %61 : vector<16x128xf32>
    %63 = vector.extract_strided_slice %44 {offsets = [32, 0], sizes = [16, 128], strides = [1, 1]} : vector<48x128xf32> to vector<16x128xf32>
    %c0_27 = arith.constant 0 : index
    %c0_28 = arith.constant 0 : index
    %64 = vector.load %arg4[%c0_27, %c0_28] : memref<16x16xf32, #tpu.memory_space<vmem>>, vector<16x16xf32>
    %65 = arith.mulf %62, %40 : vector<16x128xf32>
    %cst_29 = arith.constant dense<0.000000e+00> : vector<16x128xf32>
    %66 = tpu.matmul %64, %65, %cst_29 {dimension_numbers = #tpu.dot_dimension_numbers<[1], [0], [0], [1], [0, 0, 1, 1], [], []>} : vector<16x16xf32>, vector<16x128xf32>, vector<16x128xf32> -> vector<16x128xf32>
    %67 = arith.addf %63, %66 : vector<16x128xf32>
    %cst_30 = arith.constant 0.000000e+00 : f32
    %68 = vector.broadcast %cst_30 : f32 to vector<16x128xf32>
    %69 = arith.maximumf %67, %68 : vector<16x128xf32>
    %cst_31 = arith.constant 1.000000e+00 : f32
    %70 = vector.broadcast %cst_31 : f32 to vector<16x128xf32>
    %71 = arith.subf %70, %54 : vector<16x128xf32>
    %72 = arith.mulf %71, %40 : vector<16x128xf32>
    %73 = arith.mulf %54, %69 : vector<16x128xf32>
    %74 = arith.addf %72, %73 : vector<16x128xf32>
    %c1 = arith.constant 1 : index
    %c0_32 = arith.constant 0 : index
    %c0_33 = arith.constant 0 : index
    %75 = vector.load %arg7[%c1, %c0_32, %c0_33] : memref<4x16x128xf32, #tpu.memory_space<vmem>>, vector<1x16x128xf32>
    %76 = vector.shape_cast %75 : vector<1x16x128xf32> to vector<16x128xf32>
    %77 = vector.shape_cast %74 : vector<16x128xf32> to vector<1x16x128xf32>
    tpu.vector_store %arg7[%c1, %c0_32, %c0_33], %77 {strides = array<i32>} : memref<4x16x128xf32, #tpu.memory_space<vmem>>, vector<1x16x128xf32>,
    %78 = vector.extract_strided_slice %8 {offsets = [0, 256], sizes = [48, 128], strides = [1, 1]} : vector<48x512xf32> to vector<48x128xf32>
    %c0_34 = arith.constant 0 : index
    %c0_35 = arith.constant 0 : index
    %79 = vector.load %arg3[%c0_34, %c0_35] : memref<32x16xf32, #tpu.memory_space<vmem>>, vector<32x16xf32>
    %cst_36 = arith.constant dense<0.000000e+00> : vector<32x128xf32>
    %80 = tpu.matmul %79, %74, %cst_36 {dimension_numbers = #tpu.dot_dimension_numbers<[1], [0], [0], [1], [0, 0, 1, 1], [], []>} : vector<32x16xf32>, vector<16x128xf32>, vector<32x128xf32> -> vector<32x128xf32>
    %81 = vector.extract_strided_slice %78 {offsets = [0, 0], sizes = [16, 128], strides = [1, 1]} : vector<48x128xf32> to vector<16x128xf32>
    %82 = vector.extract_strided_slice %80 {offsets = [0, 0], sizes = [16, 128], strides = [1, 1]} : vector<32x128xf32> to vector<16x128xf32>
    %83 = arith.addf %81, %82 : vector<16x128xf32>
    %84 = arith.negf %83 : vector<16x128xf32>
    %85 = math.exp %84 : vector<16x128xf32>
    %cst_37 = arith.constant 1.000000e+00 : f32
    %86 = vector.broadcast %cst_37 : f32 to vector<16x128xf32>
    %87 = arith.addf %86, %85 : vector<16x128xf32>
    %88 = arith.divf %86, %87 : vector<16x128xf32>
    %89 = vector.extract_strided_slice %78 {offsets = [16, 0], sizes = [16, 128], strides = [1, 1]} : vector<48x128xf32> to vector<16x128xf32>
    %90 = vector.extract_strided_slice %80 {offsets = [16, 0], sizes = [16, 128], strides = [1, 1]} : vector<32x128xf32> to vector<16x128xf32>
    %91 = arith.addf %89, %90 : vector<16x128xf32>
    %92 = arith.negf %91 : vector<16x128xf32>
    %93 = math.exp %92 : vector<16x128xf32>
    %cst_38 = arith.constant 1.000000e+00 : f32
    %94 = vector.broadcast %cst_38 : f32 to vector<16x128xf32>
    %95 = arith.addf %94, %93 : vector<16x128xf32>
    %96 = arith.divf %94, %95 : vector<16x128xf32>
    %97 = vector.extract_strided_slice %78 {offsets = [32, 0], sizes = [16, 128], strides = [1, 1]} : vector<48x128xf32> to vector<16x128xf32>
    %c0_39 = arith.constant 0 : index
    %c0_40 = arith.constant 0 : index
    %98 = vector.load %arg4[%c0_39, %c0_40] : memref<16x16xf32, #tpu.memory_space<vmem>>, vector<16x16xf32>
    %99 = arith.mulf %96, %74 : vector<16x128xf32>
    %cst_41 = arith.constant dense<0.000000e+00> : vector<16x128xf32>
    %100 = tpu.matmul %98, %99, %cst_41 {dimension_numbers = #tpu.dot_dimension_numbers<[1], [0], [0], [1], [0, 0, 1, 1], [], []>} : vector<16x16xf32>, vector<16x128xf32>, vector<16x128xf32> -> vector<16x128xf32>
    %101 = arith.addf %97, %100 : vector<16x128xf32>
    %cst_42 = arith.constant 0.000000e+00 : f32
    %102 = vector.broadcast %cst_42 : f32 to vector<16x128xf32>
    %103 = arith.maximumf %101, %102 : vector<16x128xf32>
    %cst_43 = arith.constant 1.000000e+00 : f32
    %104 = vector.broadcast %cst_43 : f32 to vector<16x128xf32>
    %105 = arith.subf %104, %88 : vector<16x128xf32>
    %106 = arith.mulf %105, %74 : vector<16x128xf32>
    %107 = arith.mulf %88, %103 : vector<16x128xf32>
    %108 = arith.addf %106, %107 : vector<16x128xf32>
    %c2 = arith.constant 2 : index
    %c0_44 = arith.constant 0 : index
    %c0_45 = arith.constant 0 : index
    %109 = vector.load %arg7[%c2, %c0_44, %c0_45] : memref<4x16x128xf32, #tpu.memory_space<vmem>>, vector<1x16x128xf32>
    %110 = vector.shape_cast %109 : vector<1x16x128xf32> to vector<16x128xf32>
    %111 = vector.shape_cast %108 : vector<16x128xf32> to vector<1x16x128xf32>
    tpu.vector_store %arg7[%c2, %c0_44, %c0_45], %111 {strides = array<i32>} : memref<4x16x128xf32, #tpu.memory_space<vmem>>, vector<1x16x128xf32>,
    %112 = vector.extract_strided_slice %8 {offsets = [0, 384], sizes = [48, 128], strides = [1, 1]} : vector<48x512xf32> to vector<48x128xf32>
    %c0_46 = arith.constant 0 : index
    %c0_47 = arith.constant 0 : index
    %113 = vector.load %arg3[%c0_46, %c0_47] : memref<32x16xf32, #tpu.memory_space<vmem>>, vector<32x16xf32>
    %cst_48 = arith.constant dense<0.000000e+00> : vector<32x128xf32>
    %114 = tpu.matmul %113, %108, %cst_48 {dimension_numbers = #tpu.dot_dimension_numbers<[1], [0], [0], [1], [0, 0, 1, 1], [], []>} : vector<32x16xf32>, vector<16x128xf32>, vector<32x128xf32> -> vector<32x128xf32>
    %115 = vector.extract_strided_slice %112 {offsets = [0, 0], sizes = [16, 128], strides = [1, 1]} : vector<48x128xf32> to vector<16x128xf32>
    %116 = vector.extract_strided_slice %114 {offsets = [0, 0], sizes = [16, 128], strides = [1, 1]} : vector<32x128xf32> to vector<16x128xf32>
    %117 = arith.addf %115, %116 : vector<16x128xf32>
    %118 = arith.negf %117 : vector<16x128xf32>
    %119 = math.exp %118 : vector<16x128xf32>
    %cst_49 = arith.constant 1.000000e+00 : f32
    %120 = vector.broadcast %cst_49 : f32 to vector<16x128xf32>
    %121 = arith.addf %120, %119 : vector<16x128xf32>
    %122 = arith.divf %120, %121 : vector<16x128xf32>
    %123 = vector.extract_strided_slice %112 {offsets = [16, 0], sizes = [16, 128], strides = [1, 1]} : vector<48x128xf32> to vector<16x128xf32>
    %124 = vector.extract_strided_slice %114 {offsets = [16, 0], sizes = [16, 128], strides = [1, 1]} : vector<32x128xf32> to vector<16x128xf32>
    %125 = arith.addf %123, %124 : vector<16x128xf32>
    %126 = arith.negf %125 : vector<16x128xf32>
    %127 = math.exp %126 : vector<16x128xf32>
    %cst_50 = arith.constant 1.000000e+00 : f32
    %128 = vector.broadcast %cst_50 : f32 to vector<16x128xf32>
    %129 = arith.addf %128, %127 : vector<16x128xf32>
    %130 = arith.divf %128, %129 : vector<16x128xf32>
    %131 = vector.extract_strided_slice %112 {offsets = [32, 0], sizes = [16, 128], strides = [1, 1]} : vector<48x128xf32> to vector<16x128xf32>
    %c0_51 = arith.constant 0 : index
    %c0_52 = arith.constant 0 : index
    %132 = vector.load %arg4[%c0_51, %c0_52] : memref<16x16xf32, #tpu.memory_space<vmem>>, vector<16x16xf32>
    %133 = arith.mulf %130, %108 : vector<16x128xf32>
    %cst_53 = arith.constant dense<0.000000e+00> : vector<16x128xf32>
    %134 = tpu.matmul %132, %133, %cst_53 {dimension_numbers = #tpu.dot_dimension_numbers<[1], [0], [0], [1], [0, 0, 1, 1], [], []>} : vector<16x16xf32>, vector<16x128xf32>, vector<16x128xf32> -> vector<16x128xf32>
    %135 = arith.addf %131, %134 : vector<16x128xf32>
    %cst_54 = arith.constant 0.000000e+00 : f32
    %136 = vector.broadcast %cst_54 : f32 to vector<16x128xf32>
    %137 = arith.maximumf %135, %136 : vector<16x128xf32>
    %cst_55 = arith.constant 1.000000e+00 : f32
    %138 = vector.broadcast %cst_55 : f32 to vector<16x128xf32>
    %139 = arith.subf %138, %122 : vector<16x128xf32>
    %140 = arith.mulf %139, %108 : vector<16x128xf32>
    %141 = arith.mulf %122, %137 : vector<16x128xf32>
    %142 = arith.addf %140, %141 : vector<16x128xf32>
    %c3 = arith.constant 3 : index
    %c0_56 = arith.constant 0 : index
    %c0_57 = arith.constant 0 : index
    %143 = vector.load %arg7[%c3, %c0_56, %c0_57] : memref<4x16x128xf32, #tpu.memory_space<vmem>>, vector<1x16x128xf32>
    %144 = vector.shape_cast %143 : vector<1x16x128xf32> to vector<16x128xf32>
    %145 = vector.shape_cast %142 : vector<16x128xf32> to vector<1x16x128xf32>
    tpu.vector_store %arg7[%c3, %c0_56, %c0_57], %145 {strides = array<i32>} : memref<4x16x128xf32, #tpu.memory_space<vmem>>, vector<1x16x128xf32>,
    %c0_58 = arith.constant 0 : index
    %c0_59 = arith.constant 0 : index
    %146 = vector.load %arg8[%c0_58, %c0_59] : memref<16x128xf32, #tpu.memory_space<vmem>>, vector<16x128xf32>
    tpu.vector_store %arg8[%c0_58, %c0_59], %142 {strides = array<i32>} : memref<16x128xf32, #tpu.memory_space<vmem>>, vector<16x128xf32>,
    return
  }
  func.func @transform_0(%arg0: i32) -> (i32, i32) {
    %c0_i32 = arith.constant 0 : i32
    %c0_i32_0 = arith.constant 0 : i32
    %c0_i32_1 = arith.constant 0 : i32
    return %c0_i32, %c0_i32_0 : i32, i32
  }
  func.func @transform_1(%arg0: i32) -> (i32, i32) {
    %c0_i32 = arith.constant 0 : i32
    %c0_i32_0 = arith.constant 0 : i32
    %c0_i32_1 = arith.constant 0 : i32
    return %c0_i32, %c0_i32_0 : i32, i32
  }
  func.func @transform_2(%arg0: i32) -> (i32, i32) {
    %c0_i32 = arith.constant 0 : i32
    %c0_i32_0 = arith.constant 0 : i32
    %c0_i32_1 = arith.constant 0 : i32
    return %c0_i32, %c0_i32_0 : i32, i32
  }
  func.func @transform_3(%arg0: i32) -> (i32, i32) {
    %c0_i32 = arith.constant 0 : i32
    %c0_i32_0 = arith.constant 0 : i32
    %c0_i32_1 = arith.constant 0 : i32
    return %c0_i32, %c0_i32_0 : i32, i32
  }
  func.func @transform_4(%arg0: i32) -> (i32, i32) {
    %c0_i32 = arith.constant 0 : i32
    %c0_i32_0 = arith.constant 0 : i32
    %c0_i32_1 = arith.constant 0 : i32
    return %c0_i32, %c0_i32_0 : i32, i32
  }
  func.func @transform_5(%arg0: i32) -> (i32, i32, i32) {
    %c0_i32 = arith.constant 0 : i32
    %c0_i32_0 = arith.constant 0 : i32
    %c0_i32_1 = arith.constant 0 : i32
    return %arg0, %c0_i32, %c0_i32_0 : i32, i32, i32
  }
  func.func @transform_6(%arg0: i32) -> (i32, i32, i32) {
    %c0_i32 = arith.constant 0 : i32
    %c0_i32_0 = arith.constant 0 : i32
    %c0_i32_1 = arith.constant 0 : i32
    return %arg0, %c0_i32, %c0_i32_0 : i32, i32, i32
  }
}

</mosaic_0001>

<bundles_post_ra>
// kernel: tpu_custom_call.1
= control target key start
LH: loop header
LB: loop body
LE: loop exit
PB: predicated region body
PF: predicated region fallthrough
CT: control target
= control target key end

     0   :  { %11 = vsyncpa [#allocation4], 0  ;;  %s2090_s0 = inlined_call_operand.hbm [shape: f32[16,128], index: 0, kind: input, shape index: {}]   ;;  %s2091_s1 = inlined_call_operand.hbm [shape: f32[48,16], index: 1, kind: input, shape index: {}]   ;;  %s2092_s2 = inlined_call_operand.hbm [shape: f32[32,16], index: 2, kind: input, shape index: {}]   ;;  %s2093_s3 = inlined_call_operand.hbm [shape: f32[16,16], index: 3, kind: input, shape index: {}]   ;;  %s2094_s4 = inlined_call_operand.hbm [shape: f32[48,512], index: 4, kind: input, shape index: {}]   ;;  %s2095_s5 = inlined_call_operand.hbm [shape: f32[1,16,512], index: 5, kind: input, shape index: {}]   ;;  %s2096_s6 = inlined_call_operand.hbm [shape: f32[4,16,128], index: 6, kind: output, shape index: {}]  }
   0x1   :  { %12 = vsyncpa [#allocation7], 0 }
   0x2   :  { %13 = vsyncpa [#allocation10], 0 }
   0x3   :  { %14 = vsyncpa [#allocation13], 0 }
   0x4   :  { %15 = vsyncpa [#allocation5], 0  ;;  %s1752_s21 = smov [#allocation6]   ;;  %s1753_s23 = smov [#allocation9]  }
   0x5   :  { %s33_s22 = sshll.u32 %s1752_s21, 4  ;;  %s57_s24 = sshll.u32 %s1753_s23, 4  ;;  %s34_s22 = int_to_ptr.vmem [resolvable:$true] %s33_s22  ;;  %s1799_s24 = int_to_ptr.vmem [resolvable:$true] %s57_s24 }
   0x6   :  { %s1588_s27 = scalar_lea.hbm %s2091_s1, 768 }
   0x7   :  { %p1589_p0 = scmp.ne.s32.totalorder %s2091_s1, %s1588_s27  ;;  %p1592_p1 = scmp.lt.u32.totalorder %s1588_s27, %s2091_s1 }
   0x9   :  { %p1594_p2 = pnand %p1592_p1, %p1589_p0 }
   0xb   :  { %1597 = shalt.err (!%p1594_p2)
}
   0xc   :  { %s1598_s8 = scalar_lea.vmem %s34_s22, 768  ;;  %p1603_p4 = scmp.lt.s32.totalorder %s34_s22, %s34_s22 }
   0xd   :  { %p1599_p3 = scmp.ne.s32.totalorder %s34_s22, %s1598_s8  ;;  %p1604_p5 = scmp.lt.s32.totalorder %s1598_s8, %s1598_s8 }
   0xf   :  { %p1605_p6 = por %p1604_p5, %p1603_p4 }
  0x11   :  { %p1606_p7 = pnand %p1605_p6, %p1599_p3 }
  0x13   :  { %1609 = shalt.err (!%p1606_p7)
}
  0x14   :  { %s1754_s9 = smov 128   ;;  %s1755_s10 = smov 8  }
  0x15   :  { %39 = dma.hbm_to_vmem [thread:$0]  %s2091_s1, 768, %s34_s22, [#allocation7], %s1754_s9, %s1754_s9, %s1755_s10  }
  0x16   :  { %s1610_s15 = scalar_lea.hbm %s2093_s3, 256 }
  0x17   :  { %p1611_p8 = scmp.ne.s32.totalorder %s2093_s3, %s1610_s15  ;;  %p1614_p9 = scmp.lt.u32.totalorder %s1610_s15, %s2093_s3 }
  0x19   :  { %p1616_p10 = pnand %p1614_p9, %p1611_p8 }
  0x1b   :  { %1619 = shalt.err (!%p1616_p10)
}
  0x1c   :  { %s1620_s20 = scalar_lea.vmem %s1799_s24, 256  ;;  %p1625_p12 = scmp.lt.s32.totalorder %s1799_s24, %s1799_s24 }
  0x1d   :  { %p1621_p11 = scmp.ne.s32.totalorder %s1799_s24, %s1620_s20  ;;  %p1626_p13 = scmp.lt.s32.totalorder %s1620_s20, %s1620_s20 }
  0x1f   :  { %p1627_p0 = por %p1626_p13, %p1625_p12 }
  0x21   :  { %p1628_p1 = pnand %p1627_p0, %p1621_p11 }
  0x23   :  { %1631 = shalt.err (!%p1628_p1)
}
  0x24   :  { %63 = dma.hbm_to_vmem [thread:$0]  %s2093_s3, 256, %s1799_s24, [#allocation10], %s1754_s9, %s1754_s9, %s1755_s10  }
  0x25   :  { %s1756_s22 = smov [#allocation3]   ;;  %s1757_s25 = smov [#allocation8]  }
  0x26   :  { %s21_s23 = sshll.u32 %s1756_s22, 4  ;;  %s45_s26 = sshll.u32 %s1757_s25, 4  ;;  %s22_s23 = int_to_ptr.vmem [resolvable:$true] %s21_s23  ;;  %s1836_s26 = int_to_ptr.vmem [resolvable:$true] %s45_s26 }
  0x27   :  { %s1632_s29 = scalar_lea.hbm %s2090_s0, 256 }
  0x28   :  { %p1633_p2 = scmp.ne.s32.totalorder %s2090_s0, %s1632_s29  ;;  %p1636_p3 = scmp.lt.u32.totalorder %s1632_s29, %s2090_s0 }
  0x2a   :  { %p1638_p4 = pnand %p1636_p3, %p1633_p2 }
  0x2c   :  { %1641 = shalt.err (!%p1638_p4)
}
  0x2d   :  { %s1642_s3 = scalar_lea.vmem %s22_s23, 256  ;;  %p1647_p6 = scmp.lt.s32.totalorder %s22_s23, %s22_s23 }
  0x2e   :  { %p1643_p5 = scmp.ne.s32.totalorder %s22_s23, %s1642_s3  ;;  %p1648_p7 = scmp.lt.s32.totalorder %s1642_s3, %s1642_s3 }
  0x30   :  { %p1649_p8 = por %p1648_p7, %p1647_p6 }
  0x32   :  { %p1650_p9 = pnand %p1649_p8, %p1643_p5 }
  0x34   :  { %1653 = shalt.err (!%p1650_p9)
}
  0x35   :  { %27 = dma.hbm_to_vmem [thread:$0]  %s2090_s0, 256, %s22_s23, [#allocation4], %s1754_s9, %s1754_s9, %s1755_s10  }
  0x36   :  { %s1654_s15 = scalar_lea.hbm %s2092_s2, 512 }
  0x37   :  { %p1655_p10 = scmp.ne.s32.totalorder %s2092_s2, %s1654_s15  ;;  %p1658_p11 = scmp.lt.u32.totalorder %s1654_s15, %s2092_s2 }
  0x39   :  { %p1660_p12 = pnand %p1658_p11, %p1655_p10 }
  0x3b   :  { %1663 = shalt.err (!%p1660_p12)
}
  0x3c   :  { %s1664_s20 = scalar_lea.vmem %s1836_s26, 512  ;;  %p1669_p0 = scmp.lt.s32.totalorder %s1836_s26, %s1836_s26 }
  0x3d   :  { %p1665_p13 = scmp.ne.s32.totalorder %s1836_s26, %s1664_s20  ;;  %p1670_p1 = scmp.lt.s32.totalorder %s1664_s20, %s1664_s20 }
  0x3f   :  { %p1671_p2 = por %p1670_p1, %p1669_p0 }
  0x41   :  { %p1672_p3 = pnand %p1671_p2, %p1665_p13 }
  0x43   :  { %1675 = shalt.err (!%p1672_p3)
}
  0x44   :  { %51 = dma.hbm_to_vmem [thread:$0]  %s2092_s2, 512, %s1836_s26, [#allocation7], %s1754_s9, %s1754_s9, %s1755_s10  }
  0x45   :  { %s1758_s21 = smov [#allocation11]   ;;  %s1676_s27 = scalar_lea.hbm %s2094_s4, 3072 }
  0x46   :  { %s69_s22 = sshll.u32 %s1758_s21, 4  ;;  %p1677_p4 = scmp.ne.s32.totalorder %s2094_s4, %s1676_s27  ;;  %s70_s22 = int_to_ptr.vmem [resolvable:$true] %s69_s22 }
  0x47   :  { %p1680_p5 = scmp.lt.u32.totalorder %s1676_s27, %s2094_s4 }
  0x49   :  { %p1682_p6 = pnand %p1680_p5, %p1677_p4 }
  0x4b   :  { %1685 = shalt.err (!%p1682_p6)
}
  0x4c   :  { %s1686_s8 = scalar_lea.vmem %s70_s22, 3072  ;;  %p1691_p8 = scmp.lt.s32.totalorder %s70_s22, %s70_s22 }
  0x4d   :  { %p1687_p7 = scmp.ne.s32.totalorder %s70_s22, %s1686_s8  ;;  %p1692_p9 = scmp.lt.s32.totalorder %s1686_s8, %s1686_s8 }
  0x4f   :  { %p1693_p10 = por %p1692_p9, %p1691_p8 }
  0x51   :  { %p1694_p11 = pnand %p1693_p10, %p1687_p7 }
  0x53   :  { %1697 = shalt.err (!%p1694_p11)
}
  0x54   :  { %s1759_s2 = smov 512   ;;  %s1760_s26 = smov 32  }
  0x55   :  { %75 = dma.hbm_to_vmem [thread:$0]  %s2094_s4, 3072, %s70_s22, [#allocation10], %s1759_s2, %s1759_s2, %s1760_s26  }
  0x56   :  { %s1761_s24 = smov [#allocation12]   ;;  %s1698_s15 = scalar_lea.hbm %s2095_s5, 1024 }
  0x57   :  { %s81_s12 = sshll.u32 %s1761_s24, 4  ;;  %p1699_p12 = scmp.ne.s32.totalorder %s2095_s5, %s1698_s15  ;;  %s82_s12 = int_to_ptr.vmem [resolvable:$true] %s81_s12 }
  0x58   :  { %p1702_p13 = scmp.lt.u32.totalorder %s1698_s15, %s2095_s5 }
  0x5a   :  { %p1704_p0 = pnand %p1702_p13, %p1699_p12 }
  0x5c   :  { %1707 = shalt.err (!%p1704_p0)
}
  0x5d   :  { %s1708_s20 = scalar_lea.vmem %s82_s12, 1024  ;;  %p1713_p2 = scmp.lt.s32.totalorder %s82_s12, %s82_s12 }
  0x5e   :  { %p1709_p1 = scmp.ne.s32.totalorder %s82_s12, %s1708_s20  ;;  %p1714_p3 = scmp.lt.s32.totalorder %s1708_s20, %s1708_s20 }
  0x60   :  { %p1715_p4 = por %p1714_p3, %p1713_p2 }
  0x62   :  { %p1716_p5 = pnand %p1715_p4, %p1709_p1 }
  0x64   :  { %1719 = shalt.err (!%p1716_p5)
}
  0x65   :  { %87 = dma.hbm_to_vmem [thread:$0]  %s2095_s5, 1024, %s82_s12, [#allocation13], %s1759_s2, %s1759_s2, %s1760_s26  }
  0x66   :  { %1742 = dma.done.wait [#allocation4], 256  }
  0x67   :  { %1743 = vsyncadd [#allocation4], 4294967040 }
  0x68   :  { %1744 = dma.done.wait [#allocation7], 1280  }
  0x69   :  { %1745 = vsyncadd [#allocation7], 4294966016 }
  0x6a   :  { %1746 = dma.done.wait [#allocation10], 3328  }
  0x6b   :  { %1747 = vsyncadd [#allocation10], 4294963968 }
  0x6c   :  { %1748 = dma.done.wait [#allocation13], 1024  }
  0x6d   :  { %1749 = vsyncadd [#allocation13], 4294966272  ;;  %v1762_v0 = vmov 0.0   ;;  %v121_v1 = vld [vmem:[#allocation12 + $0x8] sm:$0xff]  ;;  %v120_v3 = vld [vmem:[#allocation12] sm:$0xff]  ;;  %vm152_vm0 = vcmask 130048  }
  0x6e   :  { %235 = vmatprep.mubr.f32.mxu0 %v1762_v0  ;;  %336 = vmatprep.mubr.f32.mxu1 %v1762_v0  ;;  %v125_v2 = vld [vmem:[#allocation12 + $0x28] sm:$0xff]  ;;  %v124_v5 = vld [vmem:[#allocation12 + $0x20] sm:$0xff]  ;;  %v1897_v7 = vld [vmem:[#allocation3] sm:$0xff]  ;;  %s1763_s5 = smov [#allocation14]  }
  0x6f   :  { %v1472_v4 = vpack.c.bf16 %v125_v2, %v121_v1  ;;  %v1474_v6 = vpack.c.bf16 %v124_v5, %v120_v3  ;;  %v1899_v8 = vld [vmem:[#allocation3 + $0x8] sm:$0xff]  ;;  %v114_v9 = vld [vmem:[#allocation6] sm:$0xff]  ;;  %v115_v11 = vld [vmem:[#allocation6 + $0x8] sm:$0xff]  ;;  %s1297_s1 = sshll.u32 %s1763_s5, 4  ;;  %s1298_s1 = int_to_ptr.vmem [resolvable:$true] %s1297_s1 }
  0x70   :  { %v1480_v10 = vpack.c.bf16 %v1899_v8, %v1897_v7  ;;  %v116_v12 = vld [vmem:[#allocation6 + $0x10] sm:$0xff]  ;;  %v117_v13 = vld [vmem:[#allocation6 + $0x18] sm:$0xff]  ;;  %v118_v14 = vld [vmem:[#allocation6 + $0x20] sm:$0xff]  ;;  %s1720_s21 = scalar_lea.vmem %s1298_s1, 1024  ;;  %p1725_p7 = scmp.lt.s32.totalorder %s1298_s1, %s1298_s1 }
  0x71   :  { %1473 = vmatprep.subr.bf16.mxu0 %v1472_v4  ;;  %v119_v15 = vld [vmem:[#allocation6 + $0x28] sm:$0xff]  ;;  %v1908_v16 = vld [vmem:[#allocation8] sm:$0xff]  ;;  %v1913_v17 = vld [vmem:[#allocation8 + $0x8] sm:$0xff]  ;;  %p1721_p6 = scmp.ne.s32.totalorder %s1298_s1, %s1720_s21  ;;  %p1726_p8 = scmp.lt.s32.totalorder %s1720_s21, %s1720_s21 }
  0x72   :  { %1475 = vmatpush1.bf16.msra.mxu0 %v1474_v6  ;;  %v1915_v18 = vld [vmem:[#allocation8 + $0x10] sm:$0xff]  ;;  %v1921_v19 = vld [vmem:[#allocation8 + $0x18] sm:$0xff]  ;;  %v123_v20 = vld [vmem:[#allocation12 + $0x18] sm:$0xff] }
  0x73   :  { %1481 = vmatprep.subr.bf16.mxu0 %v1480_v10  ;;  %v127_v21 = vld [vmem:[#allocation12 + $0x38] sm:$0xff]  ;;  %v122_v23 = vld [vmem:[#allocation12 + $0x10] sm:$0xff]  ;;  %v132_v37 = vld [vmem:[#allocation11 + $0x20] sm:$0xff]  ;;  %p1727_p9 = por %p1726_p8, %p1725_p7 }
  0x74   :  { %v1476_v22 = vpack.c.bf16 %v127_v21, %v123_v20  ;;  %v126_v24 = vld [vmem:[#allocation12 + $0x30] sm:$0xff]  ;;  %v128_v39 = vld [vmem:[#allocation11] sm:$0xff]  ;;  %v1955_v2 = vld [vmem:[#allocation9 + $0x8] sm:$0xff] }
  0x75   :  { %1312 = vmatmul.mubr.msk.f32.vlgmr.msra.gmra.mrb[0].mxu0 %vm152_vm0, %v114_v9  ;;  %v1478_v25 = vpack.c.bf16 %v126_v24, %v122_v23  ;;  %v1931_v26 = vld [vmem:[#allocation9] sm:$0xff]  ;;  %v140_v43 = vld [vmem:[#allocation11 + $0x60] sm:$0xff]  ;;  %p1728_p10 = pnand %p1727_p9, %p1721_p6 }
  0x76   :  { %241 = vmatprep.mubr.f32.mxu0 %v1762_v0  ;;  %1483 = vmatpush3.bf16.msra.mxu0 %v1480_v10  ;;  %v136_v45 = vld [vmem:[#allocation11 + $0x40] sm:$0xff] }
  0x77   :  { %1477 = vmatprep.subr.bf16.mxu1 %v1476_v22 }
  0x78   :  { %1479 = vmatpush1.bf16.msra.mxu1 %v1478_v25 }
  0x79   :  { %1313 = vmatmul.mubr.msk.f32.gmra.mrb[2].mxu0 %vm152_vm0, %v115_v11 }
  0x7a   :  { %247 = vmatprep.mubr.f32.mxu0 %v1762_v0 }
  0x7b   :  { %1318 = vmatmul.mubr.msk.f32.vlgmr.msra.gmra.mrb[0].mxu1 %vm152_vm0, %v114_v9 }
  0x7c   :  { %342 = vmatprep.mubr.f32.mxu1 %v1762_v0 }
  0x7d   :  { %1314 = vmatmul.mubr.msk.f32.gmra.mrb[4].mxu0 %vm152_vm0, %v116_v12 }
  0x7e   :  { %253 = vmatprep.mubr.f32.mxu0 %v1762_v0 }
  0x7f   :  { %1319 = vmatmul.mubr.msk.f32.gmra.mrb[2].mxu1 %vm152_vm0, %v115_v11 }
  0x80   :  { %348 = vmatprep.mubr.f32.mxu1 %v1762_v0 }
  0x81   :  { %1315 = vmatmul.mubr.msk.f32.gmra.mrb[6].mxu0 %vm152_vm0, %v117_v13 }
  0x82   :  { %259 = vmatprep.mubr.f32.mxu0 %v1762_v0 }
  0x83   :  { %1320 = vmatmul.mubr.msk.f32.gmra.mrb[4].mxu1 %vm152_vm0, %v116_v12 }
  0x84   :  { %354 = vmatprep.mubr.f32.mxu1 %v1762_v0 }
  0x85   :  { %1316 = vmatmul.mubr.msk.f32.gmra.mrb[8].mxu0 %vm152_vm0, %v118_v14 }
  0x86   :  { %265 = vmatprep.mubr.f32.mxu0 %v1762_v0 }
  0x87   :  { %1321 = vmatmul.mubr.msk.f32.gmra.mrb[6].mxu1 %vm152_vm0, %v117_v13 }
  0x88   :  { %360 = vmatprep.mubr.f32.mxu1 %v1762_v0 }
  0x89   :  { %1317 = vmatmul.mubr.msk.f32.gmra.mrb[10].mxu0 %vm152_vm0, %v119_v15 }
  0x8a   :  { %1408 = vmatprep.mubr.msk.f32.mxu0 %vm152_vm0, %v1908_v16 }
  0x8b   :  { %1322 = vmatmul.mubr.msk.f32.gmra.mrb[8].mxu1 %vm152_vm0, %v118_v14 }
  0x8c   :  { %366 = vmatprep.mubr.f32.mxu1 %v1762_v0 }
  0x8d   :  { %1409 = vmatmul.mubr.msk.f32.vlgmr.msra.gmra.mrb[12].mxu0 %vm152_vm0, %v1913_v17 }
  0x8e   :  { %1411 = vmatprep.mubr.msk.f32.mxu0 %vm152_vm0, %v1915_v18 }
  0x8f   :  { %1323 = vmatmul.mubr.msk.f32.gmra.mrb[10].mxu1 %vm152_vm0, %v119_v15 }
  0x90   :  { %1418 = vmatprep.mubr.msk.f32.mxu1 %vm152_vm0, %v1931_v26 }
  0x91   :  { %1412 = vmatmul.mubr.msk.f32.gmra.mrb[14].mxu0 %vm152_vm0, %v1921_v19 }
  0x92   :  { %1435 = vmatprep.mubr.msk.f32.mxu0 %vm152_vm0, %v1931_v26 }
 0x148   :  { %v237_v27 = vpop.f32.mrb[0].mxu0 }
 0x149   :  { %v1937_v28 = vpop.f32.mrb[1].mxu0  ;;  %v238_v42 = vadd.f32 %v237_v27, %v128_v39 }
 0x14c   :  { %v243_v29 = vpop.f32.mrb[2].mxu0 }
 0x14d   :  { %v1939_v30 = vpop.f32.mrb[3].mxu0  ;;  %v244_v41 = vadd.f32 %v243_v29, %v132_v37  ;;  %v148_v29 = vld [vmem:[#allocation11 + $0xa0] sm:$0xff] }
 0x14e   :  { %v1961_v3 = vpop.f32.mrb[0].mxu1 }
 0x14f   :  { %v1963_v4 = vpop.f32.mrb[1].mxu1 }
 0x150   :  { %v249_v31 = vpop.f32.mrb[4].mxu0 }
 0x151   :  { %v1941_v32 = vpop.f32.mrb[5].mxu0  ;;  %v250_v50 = vadd.f32 %v249_v31, %v136_v45  ;;  %v144_v31 = vld [vmem:[#allocation11 + $0x80] sm:$0xff] }
 0x152   :  { %v1965_v5 = vpop.f32.mrb[2].mxu1 }
 0x153   :  { %v1967_v6 = vpop.f32.mrb[3].mxu1 }
 0x154   :  { %v255_v33 = vpop.f32.mrb[6].mxu0 }
 0x155   :  { %v1943_v34 = vpop.f32.mrb[7].mxu0  ;;  %v256_v49 = vadd.f32 %v255_v33, %v140_v43 }
 0x156   :  { %v1969_v9 = vpop.f32.mrb[4].mxu1 }
 0x157   :  { %v1971_v10 = vpop.f32.mrb[5].mxu1 }
 0x158   :  { %v1945_v35 = vpop.f32.mrb[8].mxu0 }
 0x159   :  { %v1947_v36 = vpop.f32.mrb[9].mxu0 }
 0x15a   :  { %v1973_v11 = vpop.f32.mrb[6].mxu1 }
 0x15b   :  { %v1975_v12 = vpop.f32.mrb[7].mxu1 }
 0x15c   :  { %v1949_v38 = vpop.f32.mrb[10].mxu0 }
 0x15d   :  { %v1951_v40 = vpop.f32.mrb[11].mxu0  ;;  %v268_v39 = vadd.f32 %v1949_v38, %v148_v29 }
 0x15e   :  { %v1977_v13 = vpop.f32.mrb[8].mxu1 }
 0x15f   :  { %v1979_v14 = vpop.f32.mrb[9].mxu1 }
 0x160   :  { %v1410_v44 = vpop.f32.mrb[12].mxu0 }
 0x161   :  { %v477_v46 = vadd.f32 %v1410_v44, %v244_v41  ;;  %v457_v47 = vpop.f32.mrb[13].mxu0  ;;  %v262_v41 = vadd.f32 %v1945_v35, %v144_v31 }
 0x162   :  { %v476_v48 = vadd.f32 %v457_v47, %v238_v42  ;;  %v1981_v15 = vpop.f32.mrb[10].mxu1 }
 0x163   :  { %v1983_v20 = vpop.f32.mrb[11].mxu1  ;;  %v1329_v21 = vmul.f32 -1.442695, %v477_v46 }
 0x164   :  { %v1413_v51 = vpop.f32.mrb[14].mxu0  ;;  %v1328_v22 = vmul.f32 -1.442695, %v476_v48 }
 0x165   :  { %v491_v52 = vadd.f32 %v1413_v51, %v256_v49  ;;  %v467_v53 = vpop.f32.mrb[15].mxu0 }
 0x166   :  { %v490_v54 = vadd.f32 %v467_v53, %v250_v50 }
 0x167   :  { %v1331_v55 = vmul.f32 -1.442695, %v491_v52 }
 0x168   :  { %v1330_v56 = vmul.f32 -1.442695, %v490_v54 }
 0x169   :  { %1524 = vpow2.f32 %v1331_v55 }
 0x16a   :  { %1526 = vpow2.f32 %v1330_v56 }
 0x173   :  { %v1525_v57 = vpop.eup %1524 }
 0x174   :  { %v1527_v58 = vpop.eup %1526  ;;  %v499_v59 = vadd.f32 1.0, %v1525_v57  ;;  %v141_v57 = vld [vmem:[#allocation11 + $0x68] sm:$0xff] }
 0x175   :  { %v498_v60 = vadd.f32 1.0, %v1527_v58 }
 0x176   :  { %1528 = vrcp.f32 %v499_v59  ;;  %v137_v59 = vld [vmem:[#allocation11 + $0x48] sm:$0xff] }
 0x177   :  { %1530 = vrcp.f32 %v498_v60 }
 0x178   :  { %1532 = vpow2.f32 %v1329_v21 }
 0x179   :  { %1534 = vpow2.f32 %v1328_v22 }
 0x180   :  { %v1529_v61 = vpop.eup %1528 }
 0x181   :  { %v1531_v62 = vpop.eup %1530  ;;  %v507_v63 = vmul.f32 %v1529_v61, %v1899_v8 }
 0x182   :  { %v506_v0 = vmul.f32 %v1531_v62, %v1897_v7  ;;  %v1533_v23 = vpop.eup %1532 }
 0x183   :  { %v1535_v24 = vpop.eup %1534  ;;  %v485_v25 = vadd.f32 1.0, %v1533_v23 }
 0x184   :  { %v1484_v1 = vpack.c.bf16 %v507_v63, %v506_v0  ;;  %v484_v27 = vadd.f32 1.0, %v1535_v24  ;;  %v258_v63 = vadd.f32 %v1943_v34, %v141_v57  ;;  %v252_v0 = vadd.f32 %v1941_v32, %v137_v59 }
 0x185   :  { %1536 = vrcp.f32 %v485_v25 }
 0x186   :  { %1485 = vmatprep.subr.bf16.mxu1 %v1484_v1  ;;  %1538 = vrcp.f32 %v484_v27 }
 0x187   :  { %1487 = vmatpush3.bf16.msra.mxu1 %v1484_v1 }
 0x18a   :  { %1419 = vmatmul.mubr.msk.f32.vlgmr.msra.gmra.mrb[12].mxu1 %vm152_vm0, %v1955_v2 }
 0x18b   :  { %1425 = vmatprep.mubr.msk.f32.mxu1 %vm152_vm0, %v1908_v16 }
 0x18f   :  { %v1537_v33 = vpop.eup %1536 }
 0x190   :  { %v1539_v37 = vpop.eup %1538  ;;  %v594_v44 = vsub.f32 1.0, %v1537_v33 }
 0x191   :  { %v593_v47 = vsub.f32 1.0, %v1539_v37 }
 0x192   :  { %v596_v50 = vmul.f32 %v594_v44, %v1899_v8  ;;  %v129_v8 = vld [vmem:[#allocation11 + $0x8] sm:$0xff] }
 0x193   :  { %v595_v52 = vmul.f32 %v593_v47, %v1897_v7  ;;  %v133_v7 = vld [vmem:[#allocation11 + $0x28] sm:$0xff]  ;;  %v240_v56 = vadd.f32 %v1937_v28, %v129_v8 }
 0x194   :  { %v246_v38 = vadd.f32 %v1939_v30, %v133_v7  ;;  %v145_v47 = vld [vmem:[#allocation11 + $0x88] sm:$0xff] }
 0x25d   :  { %v1420_v42 = vpop.f32.mrb[12].mxu1 }
 0x25e   :  { %v590_v43 = vadd.f32 %v1420_v42, %v268_v39  ;;  %v580_v45 = vpop.f32.mrb[13].mxu1 }
 0x25f   :  { %v589_v46 = vadd.f32 %v580_v45, %v262_v41 }
 0x260   :  { %v592_v48 = vmax.f32 %v590_v43, 0.0 }
 0x261   :  { %v591_v49 = vmax.f32 %v589_v46, 0.0  ;;  %v149_v46 = vld [vmem:[#allocation11 + $0xa8] sm:$0xff] }
 0x262   :  { %v598_v51 = vmul.f32 %v1537_v33, %v592_v48 }
 0x263   :  { %v597_v53 = vmul.f32 %v1539_v37, %v591_v49 }
 0x264   :  { %v1989_v54 = vadd.f32 %v598_v51, %v596_v50  ;;  %v270_v50 = vadd.f32 %v1951_v40, %v149_v46  ;;  %v264_v51 = vadd.f32 %v1947_v36, %v145_v47  ;;  %v134_v40 = vld [vmem:[#allocation11 + $0x30] sm:$0xff] }
 0x265   :  { %v1991_v55 = vadd.f32 %v597_v53, %v595_v52 }
 0x266   :  { %602 = vst [vmem:[#allocation14 + $0x8] sm:$0xff] %v1989_v54 }
 0x267   :  { %601 = vst [vmem:[#allocation14] sm:$0xff] %v1991_v55  ;;  %v1488_v35 = vpack.c.bf16 %v1989_v54, %v1991_v55 }
 0x269   :  { %1489 = vmatprep.subr.bf16.mxu1 %v1488_v35 }
 0x26a   :  { %1491 = vmatpush3.bf16.msra.mxu1 %v1488_v35 }
 0x26d   :  { %1426 = vmatmul.mubr.msk.f32.vlgmr.msra.gmra.mrb[14].mxu1 %vm152_vm0, %v1913_v17 }
 0x26e   :  { %1428 = vmatprep.mubr.msk.f32.mxu1 %vm152_vm0, %v1915_v18 }
 0x271   :  { %1429 = vmatmul.mubr.msk.f32.gmra.mrb[16].mxu1 %vm152_vm0, %v1921_v19 }
 0x272   :  { %1452 = vmatprep.mubr.msk.f32.mxu1 %vm152_vm0, %v1931_v26 }
 0x340   :  { %v1427_v58 = vpop.f32.mrb[14].mxu1 }
 0x341   :  { %v705_v60 = vadd.f32 %v1427_v58, %v246_v38  ;;  %v685_v61 = vpop.f32.mrb[15].mxu1 }
 0x342   :  { %v704_v62 = vadd.f32 %v685_v61, %v240_v56 }
 0x343   :  { %v1339_v39 = vmul.f32 -1.442695, %v705_v60 }
 0x344   :  { %v1430_v1 = vpop.f32.mrb[16].mxu1  ;;  %v1338_v41 = vmul.f32 -1.442695, %v704_v62 }
 0x345   :  { %v719_v21 = vadd.f32 %v1430_v1, %v258_v63  ;;  %v695_v22 = vpop.f32.mrb[17].mxu1  ;;  %v142_v1 = vld [vmem:[#allocation11 + $0x70] sm:$0xff] }
 0x346   :  { %v718_v23 = vadd.f32 %v695_v22, %v252_v0  ;;  %v138_v22 = vld [vmem:[#allocation11 + $0x50] sm:$0xff] }
 0x347   :  { %v1341_v24 = vmul.f32 -1.442695, %v719_v21 }
 0x348   :  { %v1340_v25 = vmul.f32 -1.442695, %v718_v23 }
 0x349   :  { %1540 = vpow2.f32 %v1341_v24 }
 0x34a   :  { %1542 = vpow2.f32 %v1340_v25 }
 0x353   :  { %v1541_v30 = vpop.eup %1540 }
 0x354   :  { %v1543_v28 = vpop.eup %1542  ;;  %v727_v27 = vadd.f32 1.0, %v1541_v30  ;;  %v357_v30 = vadd.f32 %v1973_v11, %v142_v1  ;;  %v143_v1 = vld [vmem:[#allocation11 + $0x78] sm:$0xff] }
 0x355   :  { %v726_v29 = vadd.f32 1.0, %v1543_v28  ;;  %v351_v28 = vadd.f32 %v1969_v9, %v138_v22  ;;  %v139_v22 = vld [vmem:[#allocation11 + $0x58] sm:$0xff] }
 0x356   :  { %1544 = vrcp.f32 %v727_v27 }
 0x357   :  { %1546 = vrcp.f32 %v726_v29 }
 0x358   :  { %1548 = vpow2.f32 %v1339_v39 }
 0x359   :  { %1550 = vpow2.f32 %v1338_v41 }
 0x360   :  { %v1545_v31 = vpop.eup %1544 }
 0x361   :  { %v1547_v33 = vpop.eup %1546  ;;  %v735_v34 = vmul.f32 %v1545_v31, %v1989_v54 }
 0x362   :  { %v734_v32 = vmul.f32 %v1547_v33, %v1991_v55  ;;  %v1549_v42 = vpop.eup %1548 }
 0x363   :  { %v1551_v43 = vpop.eup %1550  ;;  %v713_v44 = vadd.f32 1.0, %v1549_v42 }
 0x364   :  { %v1492_v37 = vpack.c.bf16 %v735_v34, %v734_v32  ;;  %v712_v45 = vadd.f32 1.0, %v1551_v43 }
 0x365   :  { %1552 = vrcp.f32 %v713_v44 }
 0x366   :  { %1493 = vmatprep.subr.bf16.mxu0 %v1492_v37  ;;  %1554 = vrcp.f32 %v712_v45 }
 0x367   :  { %1495 = vmatpush3.bf16.msra.mxu0 %v1492_v37 }
 0x36a   :  { %1436 = vmatmul.mubr.msk.f32.vlgmr.msra.gmra.mrb[16].mxu0 %vm152_vm0, %v1955_v2 }
 0x36b   :  { %1442 = vmatprep.mubr.msk.f32.mxu0 %vm152_vm0, %v1908_v16 }
 0x36f   :  { %v1553_v48 = vpop.eup %1552 }
 0x370   :  { %v1555_v49 = vpop.eup %1554  ;;  %v822_v35 = vsub.f32 1.0, %v1553_v48 }
 0x371   :  { %v821_v38 = vsub.f32 1.0, %v1555_v49 }
 0x372   :  { %v824_v58 = vmul.f32 %v822_v35, %v1989_v54  ;;  %v130_v54 = vld [vmem:[#allocation11 + $0x10] sm:$0xff] }
 0x373   :  { %v823_v60 = vmul.f32 %v821_v38, %v1991_v55  ;;  %v345_v55 = vadd.f32 %v1965_v5, %v134_v40  ;;  %v339_v0 = vadd.f32 %v1961_v3, %v130_v54 }
 0x43d   :  { %v1437_v52 = vpop.f32.mrb[16].mxu0 }
 0x43e   :  { %v818_v53 = vadd.f32 %v1437_v52, %v270_v50  ;;  %v808_v7 = vpop.f32.mrb[17].mxu0  ;;  %v146_v50 = vld [vmem:[#allocation11 + $0x90] sm:$0xff] }
 0x43f   :  { %v817_v8 = vadd.f32 %v808_v7, %v264_v51  ;;  %v363_v35 = vadd.f32 %v1977_v13, %v146_v50 }
 0x440   :  { %v820_v56 = vmax.f32 %v818_v53, 0.0 }
 0x441   :  { %v819_v57 = vmax.f32 %v817_v8, 0.0 }
 0x442   :  { %v826_v59 = vmul.f32 %v1553_v48, %v820_v56 }
 0x443   :  { %v825_v61 = vmul.f32 %v1555_v49, %v819_v57  ;;  %v150_v49 = vld [vmem:[#allocation11 + $0xb0] sm:$0xff] }
 0x444   :  { %v2019_v62 = vadd.f32 %v826_v59, %v824_v58  ;;  %v369_v53 = vadd.f32 %v1981_v15, %v150_v49  ;;  %v135_v15 = vld [vmem:[#allocation11 + $0x38] sm:$0xff] }
 0x445   :  { %v2021_v63 = vadd.f32 %v825_v61, %v823_v60 }
 0x446   :  { %831 = vst [vmem:[#allocation14 + $0x18] sm:$0xff] %v2019_v62 }
 0x447   :  { %830 = vst [vmem:[#allocation14 + $0x10] sm:$0xff] %v2021_v63  ;;  %v1496_v36 = vpack.c.bf16 %v2019_v62, %v2021_v63 }
 0x449   :  { %1497 = vmatprep.subr.bf16.mxu0 %v1496_v36 }
 0x44a   :  { %1499 = vmatpush3.bf16.msra.mxu0 %v1496_v36 }
 0x44d   :  { %1443 = vmatmul.mubr.msk.f32.vlgmr.msra.gmra.mrb[18].mxu0 %vm152_vm0, %v1913_v17 }
 0x44e   :  { %1445 = vmatprep.mubr.msk.f32.mxu0 %vm152_vm0, %v1915_v18 }
 0x451   :  { %1446 = vmatmul.mubr.msk.f32.gmra.mrb[20].mxu0 %vm152_vm0, %v1921_v19 }
 0x452   :  { %1469 = vmatprep.mubr.msk.f32.mxu0 %vm152_vm0, %v1931_v26 }
 0x520   :  { %v1444_v21 = vpop.f32.mrb[18].mxu0 }
 0x521   :  { %v934_v23 = vadd.f32 %v1444_v21, %v345_v55  ;;  %v914_v24 = vpop.f32.mrb[19].mxu0 }
 0x522   :  { %v933_v25 = vadd.f32 %v914_v24, %v339_v0 }
 0x523   :  { %v1349_v43 = vmul.f32 -1.442695, %v934_v23 }
 0x524   :  { %v1447_v27 = vpop.f32.mrb[20].mxu0  ;;  %v1348_v44 = vmul.f32 -1.442695, %v933_v25 }
 0x525   :  { %v948_v29 = vadd.f32 %v1447_v27, %v357_v30  ;;  %v924_v31 = vpop.f32.mrb[21].mxu0  ;;  %v353_v30 = vadd.f32 %v1971_v10, %v139_v22 }
 0x526   :  { %v947_v26 = vadd.f32 %v924_v31, %v351_v28 }
 0x527   :  { %v1351_v33 = vmul.f32 -1.442695, %v948_v29 }
 0x528   :  { %v1350_v34 = vmul.f32 -1.442695, %v947_v26 }
 0x529   :  { %1556 = vpow2.f32 %v1351_v33 }
 0x52a   :  { %1558 = vpow2.f32 %v1350_v34 }
 0x533   :  { %v1557_v5 = vpop.eup %1556 }
 0x534   :  { %v1559_v3 = vpop.eup %1558  ;;  %v956_v32 = vadd.f32 1.0, %v1557_v5 }
 0x535   :  { %v955_v37 = vadd.f32 1.0, %v1559_v3 }
 0x536   :  { %1560 = vrcp.f32 %v956_v32 }
 0x537   :  { %1562 = vrcp.f32 %v955_v37 }
 0x538   :  { %1564 = vpow2.f32 %v1349_v43  ;;  %v147_v43 = vld [vmem:[#allocation11 + $0x98] sm:$0xff] }
 0x539   :  { %1566 = vpow2.f32 %v1348_v44 }
 0x540   :  { %v1561_v39 = vpop.eup %1560 }
 0x541   :  { %v1563_v41 = vpop.eup %1562  ;;  %v964_v11 = vmul.f32 %v1561_v39, %v2019_v62 }
 0x542   :  { %v963_v9 = vmul.f32 %v1563_v41, %v2021_v63  ;;  %v1565_v45 = vpop.eup %1564 }
 0x543   :  { %v1567_v46 = vpop.eup %1566  ;;  %v942_v47 = vadd.f32 1.0, %v1565_v45 }
 0x544   :  { %v1500_v42 = vpack.c.bf16 %v964_v11, %v963_v9  ;;  %v941_v48 = vadd.f32 1.0, %v1567_v46 }
 0x545   :  { %1568 = vrcp.f32 %v942_v47  ;;  %v365_v47 = vadd.f32 %v1979_v14, %v147_v43 }
 0x546   :  { %1501 = vmatprep.subr.bf16.mxu1 %v1500_v42  ;;  %1570 = vrcp.f32 %v941_v48 }
 0x547   :  { %1503 = vmatpush3.bf16.msra.mxu1 %v1500_v42  ;;  %v151_v42 = vld [vmem:[#allocation11 + $0xb8] sm:$0xff] }
 0x548   :  { %v371_v46 = vadd.f32 %v1983_v20, %v151_v42 }
 0x54a   :  { %1453 = vmatmul.mubr.msk.f32.vlgmr.msra.gmra.mrb[18].mxu1 %vm152_vm0, %v1955_v2 }
 0x54b   :  { %1459 = vmatprep.mubr.msk.f32.mxu1 %vm152_vm0, %v1908_v16 }
 0x54f   :  { %v1569_v51 = vpop.eup %1568 }
 0x550   :  { %v1571_v52 = vpop.eup %1570  ;;  %v1051_v8 = vsub.f32 1.0, %v1569_v51 }
 0x551   :  { %v1050_v57 = vsub.f32 1.0, %v1571_v52 }
 0x552   :  { %v1053_v60 = vmul.f32 %v1051_v8, %v2019_v62  ;;  %v131_v62 = vld [vmem:[#allocation11 + $0x18] sm:$0xff] }
 0x553   :  { %v1052_v36 = vmul.f32 %v1050_v57, %v2021_v63  ;;  %v347_v63 = vadd.f32 %v1967_v6, %v135_v15  ;;  %v341_v0 = vadd.f32 %v1963_v4, %v131_v62 }
 0x61d   :  { %v1454_v7 = vpop.f32.mrb[18].mxu1 }
 0x61e   :  { %v1047_v16 = vadd.f32 %v1454_v7, %v369_v53  ;;  %v1037_v38 = vpop.f32.mrb[19].mxu1 }
 0x61f   :  { %v1046_v56 = vadd.f32 %v1037_v38, %v363_v35 }
 0x620   :  { %v1049_v58 = vmax.f32 %v1047_v16, 0.0 }
 0x621   :  { %v1048_v59 = vmax.f32 %v1046_v56, 0.0 }
 0x622   :  { %v1055_v61 = vmul.f32 %v1569_v51, %v1049_v58 }
 0x623   :  { %v1054_v40 = vmul.f32 %v1571_v52, %v1048_v59 }
 0x624   :  { %v2049_v54 = vadd.f32 %v1055_v61, %v1053_v60 }
 0x625   :  { %v2051_v55 = vadd.f32 %v1054_v40, %v1052_v36 }
 0x626   :  { %1060 = vst [vmem:[#allocation14 + $0x28] sm:$0xff] %v2049_v54 }
 0x627   :  { %1059 = vst [vmem:[#allocation14 + $0x20] sm:$0xff] %v2051_v55  ;;  %v1504_v13 = vpack.c.bf16 %v2049_v54, %v2051_v55 }
 0x629   :  { %1505 = vmatprep.subr.bf16.mxu1 %v1504_v13 }
 0x62a   :  { %1507 = vmatpush3.bf16.msra.mxu1 %v1504_v13 }
 0x62d   :  { %1460 = vmatmul.mubr.msk.f32.vlgmr.msra.gmra.mrb[20].mxu1 %vm152_vm0, %v1913_v17  ;;  %v359_v17 = vadd.f32 %v1975_v12, %v143_v1 }
 0x62e   :  { %1462 = vmatprep.mubr.msk.f32.mxu1 %vm152_vm0, %v1915_v18 }
 0x631   :  { %1463 = vmatmul.mubr.msk.f32.gmra.mrb[22].mxu1 %vm152_vm0, %v1921_v19 }
 0x700   :  { %v1461_v21 = vpop.f32.mrb[20].mxu1 }
 0x701   :  { %v1163_v23 = vadd.f32 %v1461_v21, %v347_v63  ;;  %v1143_v24 = vpop.f32.mrb[21].mxu1 }
 0x702   :  { %v1162_v25 = vadd.f32 %v1143_v24, %v341_v0 }
 0x703   :  { %v1359_v32 = vmul.f32 -1.442695, %v1163_v23 }
 0x704   :  { %v1464_v18 = vpop.f32.mrb[22].mxu1  ;;  %v1358_v37 = vmul.f32 -1.442695, %v1162_v25 }
 0x705   :  { %v1177_v28 = vadd.f32 %v1464_v18, %v359_v17  ;;  %v1153_v27 = vpop.f32.mrb[23].mxu1 }
 0x706   :  { %v1176_v19 = vadd.f32 %v1153_v27, %v353_v30 }
 0x707   :  { %v1361_v29 = vmul.f32 -1.442695, %v1177_v28 }
 0x708   :  { %v1360_v31 = vmul.f32 -1.442695, %v1176_v19 }
 0x709   :  { %1572 = vpow2.f32 %v1361_v29 }
 0x70a   :  { %1574 = vpow2.f32 %v1360_v31 }
 0x713   :  { %v1573_v6 = vpop.eup %1572 }
 0x714   :  { %v1575_v4 = vpop.eup %1574  ;;  %v1185_v26 = vadd.f32 1.0, %v1573_v6 }
 0x715   :  { %v1184_v33 = vadd.f32 1.0, %v1575_v4 }
 0x716   :  { %1576 = vrcp.f32 %v1185_v26 }
 0x717   :  { %1578 = vrcp.f32 %v1184_v33 }
 0x718   :  { %1580 = vpow2.f32 %v1359_v32 }
 0x719   :  { %1582 = vpow2.f32 %v1358_v37 }
 0x720   :  { %v1577_v34 = vpop.eup %1576 }
 0x721   :  { %v1579_v5 = vpop.eup %1578  ;;  %v1193_v12 = vmul.f32 %v1577_v34, %v2049_v54 }
 0x722   :  { %v1192_v10 = vmul.f32 %v1579_v5, %v2051_v55  ;;  %v1581_v39 = vpop.eup %1580 }
 0x723   :  { %v1583_v41 = vpop.eup %1582  ;;  %v1171_v11 = vadd.f32 1.0, %v1581_v39 }
 0x724   :  { %v1508_v3 = vpack.c.bf16 %v1193_v12, %v1192_v10  ;;  %v1170_v9 = vadd.f32 1.0, %v1583_v41 }
 0x725   :  { %1584 = vrcp.f32 %v1171_v11 }
 0x726   :  { %1509 = vmatprep.subr.bf16.mxu0 %v1508_v3  ;;  %1586 = vrcp.f32 %v1170_v9 }
 0x727   :  { %1511 = vmatpush3.bf16.msra.mxu0 %v1508_v3 }
 0x72a   :  { %1470 = vmatmul.mubr.msk.f32.vlgmr.msra.gmra.mrb[22].mxu0 %vm152_vm0, %v1955_v2 }
 0x72f   :  { %v1585_v44 = vpop.eup %1584 }
 0x730   :  { %v1587_v45 = vpop.eup %1586  ;;  %v1280_v49 = vsub.f32 1.0, %v1585_v44 }
 0x731   :  { %v1279_v52 = vsub.f32 1.0, %v1587_v45 }
 0x732   :  { %v1282_v7 = vmul.f32 %v1280_v49, %v2049_v54 }
 0x733   :  { %v1281_v8 = vmul.f32 %v1279_v52, %v2051_v55 }
 0x7fd   :  { %v1471_v48 = vpop.f32.mrb[22].mxu0 }
 0x7fe   :  { %v1276_v2 = vadd.f32 %v1471_v48, %v371_v46  ;;  %v1266_v50 = vpop.f32.mrb[23].mxu0 }
 0x7ff   :  { %v1275_v51 = vadd.f32 %v1266_v50, %v365_v47 }
 0x800   :  { %v1278_v53 = vmax.f32 %v1276_v2, 0.0 }
 0x801   :  { %v1277_v35 = vmax.f32 %v1275_v51, 0.0 }
 0x802   :  { %v1284_v16 = vmul.f32 %v1585_v44, %v1278_v53 }
 0x803   :  { %v1283_v38 = vmul.f32 %v1587_v45, %v1277_v35 }
 0x804   :  { %v1286_v56 = vadd.f32 %v1284_v16, %v1282_v7 }
 0x805   :  { %v1285_v20 = vadd.f32 %v1283_v38, %v1281_v8 }
 0x806   :  { %1289 = vst [vmem:[#allocation14 + $0x38] sm:$0xff] %v1286_v56 }
 0x807   :  { %1288 = vst [vmem:[#allocation14 + $0x30] sm:$0xff] %v1285_v20 }
 0x808   :  { %1731 = shalt.err (!%p1728_p10)
}
 0x809   :  { %s1732_s25 = scalar_lea.hbm %s2096_s6, 1024 }
 0x80a   :  { %p1733_p11 = scmp.ne.s32.totalorder %s2096_s6, %s1732_s25  ;;  %p1736_p12 = scmp.lt.u32.totalorder %s1732_s25, %s2096_s6 }
 0x80c   :  { %p1738_p13 = pnand %p1736_p12, %p1733_p11 }
 0x80e   :  { %1741 = shalt.err (!%p1738_p13)
}
 0x80f   :  { %1303 = dma.vmem_to_hbm [thread:$0]  %s1298_s1, 1024, %s2096_s6, [#allocation5], %s1754_s9, %s1754_s9, %s1755_s10  }
 0x810   :  { %1750 = dma.done.wait [#allocation5], 1024  }
 0x811   :  { %1751 = vsyncadd [#allocation5], 4294966272 }
 0x812   :  { %1307 = vsyncpa [#allocation4], 1 }
 0x813   :  { %1308 = vsyncpa [#allocation7], 1 }
 0x814   :  { %1309 = vsyncpa [#allocation10], 1 }
 0x815   :  { %1310 = vsyncpa [#allocation13], 1 }
 0x816   :  { %1311 = vsyncpa [#allocation5], 1 }

</bundles_post_ra>
